<compile_context>
chip_gen: v6e
topology: v6e:2x2x1
jax: 0.10.0
libtpu: 0.0.40
codegen_flags: <defaults>
</compile_context>

<pallas_src>
import functools

import jax
import jax.numpy as jnp
import numpy as np
from jax import lax
from jax.experimental import pallas as pl
from jax.experimental.pallas import tpu as pltpu

SMOOTH = 1e-5        # SoftDiceLoss smooth
WEIGHT_CE = 1.0
WEIGHT_DICE = 1.0
WEIGHT_SELF = 5.0
DO_BG = False        # SoftDiceLoss do_bg (assumes C >= 2)
BATCH_DICE = False   # SoftDiceLoss batch_dice
DILATE_ITERS = 10    # 10 iterations of 3x3x3 dilation == one (2*10+1)^3 box dilation
TOP_N = 250

# lane layout of the merged stats output (B, C, STAT_W)
STAT_W = 8
_TP, _PSUM, _CNT, _FSUM, _CE, _PCNT = 0, 1, 2, 3, 4, 5


# --------------------------------------------------------------------------------------
# Kernel 1: fused dice-stats + CE + positive-feature sums, accumulated over S tiles.
# --------------------------------------------------------------------------------------
def _stats_kernel(logits_ref, feat_ref, tgt_ref, out_ref, *, S, TS, masked):
    """logits_ref/feat_ref: (1, C, TS); tgt_ref: (1, 1, TS) int; out_ref: (1, C, STAT_W) f32.

    out_ref is resident across the S grid axis (same block index for every s) and acts as the
    accumulator: lane 0 tp, 1 sum(p), 2 onehot count, 3 positive-feature sum (per class);
    lane 4 CE sum, lane 5 positive-pixel count (broadcast to every class row; the wrapper
    reads row 0).
    """
    s = pl.program_id(1)

    @pl.when(s == 0)
    def _():
        out_ref[...] = jnp.zeros_like(out_ref)

    x = logits_ref[0].astype(jnp.float32)        # (C, TS)  cast AFTER load: bf16 stays bf16 in HBM
    f = feat_ref[0].astype(jnp.float32)          # (C, TS)
    t = tgt_ref[0].astype(jnp.int32)             # (1, TS)
    C = x.shape[0]

    if masked:
        lane = lax.broadcasted_iota(jnp.int32, (1, TS), 1)
        valid = ((s * TS + lane) < S).astype(jnp.float32)   # (1, TS) — masks padded tail pixels
    else:
        valid = None

    # numerically stable softmax over the class (sublane) axis, f32 accumulation
    m = jnp.max(x, axis=0, keepdims=True)        # (1, TS)
    z = x - m
    ez = jnp.exp(z)
    denom = jnp.sum(ez, axis=0, keepdims=True)   # (1, TS)
    inv = pl.reciprocal(denom)                   # EUP; exact to keep the tight tolerance
    p = ez * inv                                 # (C, TS)

    cls = lax.broadcasted_iota(jnp.int32, (C, TS), 0)
    onehot = (cls == t).astype(jnp.float32)      # (C, TS)
    if masked:
        onehot = onehot * valid
        pm = p * valid
    else:
        pm = p

    # dice statistics (fp/fn are derived in the wrapper: fp = psum - tp, fn = cnt - tp)
    tp = jnp.sum(p * onehot, axis=1, keepdims=True)     # (C, 1)
    psum = jnp.sum(pm, axis=1, keepdims=True)           # (C, 1)
    cnt = jnp.sum(onehot, axis=1, keepdims=True)        # (C, 1)

    # cross entropy: -log p_t = log(denom) - z_t   (no full log-softmax materialized)
    z_t = jnp.sum(z * onehot, axis=0, keepdims=True)    # (1, TS)
    ce_pix = jnp.log(denom) - z_t
    if masked:
        ce_pix = ce_pix * valid
    ce_sum = jnp.sum(ce_pix, axis=1, keepdims=True)     # (1, 1)

    # self-loss pass 1: per-class feature sums over positive (label == 1) pixels
    posm = (t == 1).astype(jnp.float32)                 # (1, TS)
    if masked:
        posm = posm * valid
    fsum = jnp.sum(f * posm, axis=1, keepdims=True)     # (C, 1)
    pcnt = jnp.sum(posm, axis=1, keepdims=True)         # (1, 1)

    # assemble a full (C, STAT_W) stat tile and do ONE full-block add (no narrow lane stores)
    col = lax.broadcasted_iota(jnp.int32, (C, STAT_W), 1)
    ce_b = jnp.broadcast_to(ce_sum, (C, 1))
    pcnt_b = jnp.broadcast_to(pcnt, (C, 1))
    tile = (jnp.where(col == _TP, tp, 0.0)
            + jnp.where(col == _PSUM, psum, 0.0)
            + jnp.where(col == _CNT, cnt, 0.0)
            + jnp.where(col == _FSUM, fsum, 0.0)
            + jnp.where(col == _CE, ce_b, 0.0)
            + jnp.where(col == _PCNT, pcnt_b, 0.0))
    out_ref[...] += tile[None]


# --------------------------------------------------------------------------------------
# Kernel 2: per-pixel cosine similarity with the normalized standard positive feature.
# --------------------------------------------------------------------------------------
def _cosine_kernel(feat_ref, std_ref, cos_ref):
    """feat_ref: (1, C, TS); std_ref: (C, 1) f32 unit-norm; cos_ref: (1, 1, TS) f32."""
    f = feat_ref[0].astype(jnp.float32)                  # (C, TS)
    sn = std_ref[...]                                    # (C, 1)
    dot = jnp.sum(f * sn, axis=0, keepdims=True)         # (1, TS)
    sq = jnp.sum(f * f, axis=0, keepdims=True)           # (1, TS)
    # 1 / max(||f||, 1e-12) == rsqrt(max(||f||^2, 1e-24)); rsqrt runs on the EUP
    cos_ref[...] = (dot * lax.rsqrt(jnp.maximum(sq, 1e-24)))[None]


# --------------------------------------------------------------------------------------
# Wrappers
# --------------------------------------------------------------------------------------
def _round_up(x, m):
    return (x + m - 1) // m * m


def _pad_last(a, s_pad):
    s = a.shape[-1]
    if s_pad == s:
        return a
    return jnp.pad(a, [(0, 0)] * (a.ndim - 1) + [(0, s_pad - s)])


def _fused_stats(net_output, feature, target, *, tile_s):
    B, C = net_output.shape[0], net_output.shape[1]
    S = int(np.prod(net_output.shape[2:]))
    TS = min(tile_s, _round_up(S, 128))
    S_pad = _round_up(S, TS)
    NS = S_pad // TS

    x = _pad_last(net_output.reshape(B, C, S), S_pad)    # native dtype — no wrapper astype
    f = _pad_last(feature.reshape(B, C, S), S_pad)
    t = _pad_last(target.reshape(B, 1, S), S_pad)

    kernel = functools.partial(_stats_kernel, S=S, TS=TS, masked=(S_pad != S))

    stats = pl.pallas_call(
        kernel,
        out_shape=jax.ShapeDtypeStruct((B, C, STAT_W), jnp.float32),
        grid_spec=pltpu.PrefetchScalarGridSpec(
            num_scalar_prefetch=0,
            grid=(B, NS),
            in_specs=[
                pl.BlockSpec((1, C, TS), lambda b, s: (b, 0, s)),
                pl.BlockSpec((1, C, TS), lambda b, s: (b, 0, s)),
                pl.BlockSpec((1, 1, TS), lambda b, s: (b, 0, s)),
            ],
            out_specs=pl.BlockSpec((1, C, STAT_W), lambda b, s: (b, 0, 0)),
        ),
        compiler_params=pltpu.CompilerParams(
            dimension_semantics=("parallel", "arbitrary"),
            vmem_limit_bytes=32 * 1024 * 1024,
        ),
    )(x, f, t)
    return stats


def _cosine_map(feature, std_norm, *, tile_s):
    B, C = feature.shape[0], feature.shape[1]
    spatial = tuple(feature.shape[2:])
    S = int(np.prod(spatial))
    TS = min(tile_s, _round_up(S, 128))
    S_pad = _round_up(S, TS)
    NS = S_pad // TS

    f = _pad_last(feature.reshape(B, C, S), S_pad)
    sn = std_norm.reshape(C, 1).astype(jnp.float32)

    cos = pl.pallas_call(
        _cosine_kernel,
        out_shape=jax.ShapeDtypeStruct((B, 1, S_pad), jnp.float32),
        grid_spec=pltpu.PrefetchScalarGridSpec(
            num_scalar_prefetch=0,
            grid=(B, NS),
            in_specs=[
                pl.BlockSpec((1, C, TS), lambda b, s: (b, 0, s)),
                pl.BlockSpec((C, 1), lambda b, s: (0, 0)),
            ],
            out_specs=pl.BlockSpec((1, 1, TS), lambda b, s: (b, 0, s)),
        ),
        compiler_params=pltpu.CompilerParams(
            dimension_semantics=("parallel", "arbitrary"),
            vmem_limit_bytes=32 * 1024 * 1024,
        ),
    )(f, sn)
    return cos[:, 0, :S].reshape((B,) + spatial)


def _box_dilate(mask_f, radius):
    """Binary dilation by a (2r+1)^d box == `radius` iterations of 3^d conv>0 (separable 1-D max pools)."""
    w = 2 * radius + 1
    out = mask_f
    for axis in range(1, mask_f.ndim):
        win = [1] * mask_f.ndim
        win[axis] = w
        out = lax.reduce_window(out, -jnp.inf, lax.max, tuple(win),
                                (1,) * mask_f.ndim, "SAME")
    return out > 0


def _masked_mean(values, mask_f):
    cnt = jnp.sum(mask_f)
    return jnp.where(cnt > 0, jnp.sum(values * mask_f) / jnp.maximum(cnt, 1.0), 0.0)


def dc_and_ce_and_self_loss(feature, net_output, target, *, tile_s=8192):
    """Forward of DC_and_CE_and_self_loss (ignore_label=None, weight_ce=weight_dice=1)."""
    B, C = net_output.shape[0], net_output.shape[1]
    spatial = tuple(net_output.shape[2:])
    S = int(np.prod(spatial))

    stats = _fused_stats(net_output, feature, target, tile_s=tile_s)

    tp = stats[:, :, _TP]
    psum = stats[:, :, _PSUM]
    cnt = stats[:, :, _CNT]
    fsum = stats[:, :, _FSUM]          # (B, C) feature sums over positive pixels
    ce_sum = stats[:, 0, _CE]          # (B,)
    pos_cnt = stats[:, 0, _PCNT]       # (B,)

    fp = psum - tp
    fn = cnt - tp

    # ---- soft dice ----
    if BATCH_DICE:
        tp, fp, fn = tp.sum(0), fp.sum(0), fn.sum(0)
    nominator = 2.0 * tp + SMOOTH
    # NOTE: single-bound clip (min only) deliberately matches nnU-Net's `torch.clip(..., 1e-8)`.
    denominator = jnp.clip(2.0 * tp + fp + fn + SMOOTH, 1e-8)
    dc = nominator / denominator
    if not DO_BG:
        dc = dc[1:] if BATCH_DICE else dc[:, 1:]
    dc_loss = -jnp.mean(dc)

    # ---- cross entropy (mean over all pixels) ----
    ce_loss = jnp.sum(ce_sum) / float(B * S)

    # ---- self loss (custom_loss_functionv2) ----
    n_pos = jnp.sum(pos_cnt)
    std = jnp.sum(fsum, axis=0) / jnp.maximum(n_pos, 1.0)             # zeros when no positives
    std_norm = std / jnp.maximum(jnp.sqrt(jnp.sum(std * std)), 1e-12)

    cos = _cosine_map(feature, std_norm, tile_s=tile_s)               # (B, *spatial)

    lab = target.reshape((B,) + spatial)
    pos = lab == 1
    pos_f = pos.astype(jnp.float32)
    positive_loss = _masked_mean(1.0 - cos, pos_f)

    dil_pos = _box_dilate(pos_f, DILATE_ITERS)
    mis_f = jnp.logical_and(dil_pos, jnp.logical_not(pos)).astype(jnp.float32)
    misclassified_loss = _masked_mean(jnp.maximum(cos, 0.0), mis_f)

    # TODO(synk): top-k selection + scatter + box-dilation are structural ops with no clean Pallas
    #             equivalent; they run as plain JAX (lax.top_k / .at[].set / lax.reduce_window).
    neg = lab == 0
    masked_cos = jnp.where(neg, cos, -jnp.inf).reshape(-1)
    k = min(TOP_N, masked_cos.shape[0])
    vals, idx = lax.top_k(masked_cos, k)
    sel = jnp.isfinite(vals).astype(jnp.float32)                      # drop slots when #neg < k
    high = jnp.zeros_like(masked_cos).at[idx].set(sel).reshape((B,) + spatial)
    dil_high = _box_dilate(high, DILATE_ITERS)
    fin_f = jnp.logical_and(dil_high, jnp.logical_not(pos)).astype(jnp.float32)
    negative_dilated_loss = _masked_mean(jnp.maximum(cos, 0.0), fin_f)

    self_loss = positive_loss + misclassified_loss + negative_dilated_loss

    return WEIGHT_CE * ce_loss + WEIGHT_DICE * dc_loss + WEIGHT_SELF * self_loss


# --------------------------------------------------------------------------------------
# Pure-JAX reference (validation)
# --------------------------------------------------------------------------------------
def _reference_self_loss(feature, target):
    B, C = feature.shape[0], feature.shape[1]
    spatial = tuple(feature.shape[2:])
    lab = target.reshape((B,) + spatial)
    feat = jnp.moveaxis(feature.astype(jnp.float32), 1, -1)           # (B, *spatial, C)

    pos = lab == 1
    pos_f = pos.astype(jnp.float32)
    n_pos = jnp.sum(pos_f)
    std = jnp.sum(feat * pos_f[..., None], axis=tuple(range(feat.ndim - 1))) / jnp.maximum(n_pos, 1.0)
    std_n = std / jnp.maximum(jnp.sqrt(jnp.sum(std * std)), 1e-12)

    sq = jnp.sum(feat * feat, axis=-1)
    cos = jnp.sum(feat * std_n, axis=-1) * lax.rsqrt(jnp.maximum(sq, 1e-24))

    positive_loss = _masked_mean(1.0 - cos, pos_f)

    dil_pos = _box_dilate(pos_f, DILATE_ITERS)
    mis_f = jnp.logical_and(dil_pos, jnp.logical_not(pos)).astype(jnp.float32)
    misclassified_loss = _masked_mean(jnp.maximum(cos, 0.0), mis_f)

    neg = lab == 0
    masked_cos = jnp.where(neg, cos, -jnp.inf).reshape(-1)
    k = min(TOP_N, masked_cos.shape[0])
    vals, idx = lax.top_k(masked_cos, k)
    sel = jnp.isfinite(vals).astype(jnp.float32)
    high = jnp.zeros_like(masked_cos).at[idx].set(sel).reshape((B,) + spatial)
    dil_high = _box_dilate(high, DILATE_ITERS)
    fin_f = jnp.logical_and(dil_high, jnp.logical_not(pos)).astype(jnp.float32)
    negative_dilated_loss = _masked_mean(jnp.maximum(cos, 0.0), fin_f)

    return positive_loss + misclassified_loss + negative_dilated_loss


def _reference_loss(feature, net_output, target):
    B, C = net_output.shape[0], net_output.shape[1]
    S = int(np.prod(net_output.shape[2:]))
    x = net_output.reshape(B, C, S).astype(jnp.float32)
    t = target.reshape(B, S).astype(jnp.int32)
    p = jax.nn.softmax(x, axis=1)
    logp = jax.nn.log_softmax(x, axis=1)
    onehot = jax.nn.one_hot(t, C, axis=1, dtype=jnp.float32)
    tp = jnp.sum(p * onehot, axis=2)
    fp = jnp.sum(p * (1 - onehot), axis=2)
    fn = jnp.sum((1 - p) * onehot, axis=2)
    dc = (2 * tp + SMOOTH) / jnp.clip(2 * tp + fp + fn + SMOOTH, 1e-8)
    dc_loss = -jnp.mean(dc if DO_BG else dc[:, 1:])
    ce_loss = jnp.mean(-jnp.sum(logp * onehot, axis=1))
    self_l = _reference_self_loss(feature, target)
    return WEIGHT_CE * ce_loss + WEIGHT_DICE * dc_loss + WEIGHT_SELF * self_l


if __name__ == "__main__":
    # D=7 makes S = 7*16*16 = 1792, not a multiple of the 512-pixel tile, so both the padded/masked
    # tail path and the multi-step S accumulator path are exercised.
    B, C, D, H, W = 2, 4, 7, 16, 16
    key = jax.random.PRNGKey(0)
    k1, k2, k3 = jax.random.split(key, 3)
    feature = jax.random.normal(k1, (B, C, D, H, W), dtype=jnp.float32)
    net_output = jax.random.normal(k2, (B, C, D, H, W), dtype=jnp.float32)
    target = jax.random.randint(k3, (B, 1, D, H, W), 0, C, dtype=jnp.int32)

    fwd = jax.jit(functools.partial(dc_and_ce_and_self_loss, tile_s=512))
    ref_fwd = jax.jit(_reference_loss)

    loss = jax.block_until_ready(fwd(feature, net_output, target))
    ref = jax.block_until_ready(ref_fwd(feature, net_output, target))

    np.testing.assert_allclose(np.asarray(loss), np.asarray(ref), rtol=5e-5, atol=5e-5)
    print("KERNEL_OK")
</pallas_src>

<mosaic_0001>
module attributes {stable_mosaic.version = 11 : i64} {
  func.func @_stats_kernel(%arg0: i32, %arg1: i32, %arg2: memref<1x4x512xf32, #tpu.memory_space<vmem>>, %arg3: memref<1x4x512xf32, #tpu.memory_space<vmem>>, %arg4: memref<1x1x512xi32, #tpu.memory_space<vmem>>, %arg5: memref<1x4x8xf32, #tpu.memory_space<vmem>>) attributes {dimension_semantics = [#tpu.dimension_semantics<parallel>, #tpu.dimension_semantics<arbitrary>], iteration_bounds = array<i64: 2, 4>, scalar_prefetch = 0 : i64, scratch_operands = 0 : i64, tpu.core_type = #tpu.core_type<tc>, window_params = [{transform_indices = @transform_0, window_bounds = array<i64: 1, 4, 512>}, {transform_indices = @transform_1, window_bounds = array<i64: 1, 4, 512>}, {transform_indices = @transform_2, window_bounds = array<i64: 1, 1, 512>}, {transform_indices = @transform_3, window_bounds = array<i64: 1, 4, 8>}]} {
    %c0_i32 = arith.constant 0 : i32
    %0 = arith.cmpi eq, %arg1, %c0_i32 : i32
    %1 = arith.extui %0 : i1 to i32
    %c0_i32_0 = arith.constant 0 : i32
    %2 = arith.cmpi ne, %1, %c0_i32_0 : i32
    scf.if %2 {
      %cst_31 = arith.constant 0.000000e+00 : f32
      %112 = vector.broadcast %cst_31 : f32 to vector<1x4x8xf32>
      %c0_32 = arith.constant 0 : index
      %c0_33 = arith.constant 0 : index
      %c0_34 = arith.constant 0 : index
      %113 = vector.load %arg5[%c0_32, %c0_33, %c0_34] : memref<1x4x8xf32, #tpu.memory_space<vmem>>, vector<1x4x8xf32>
      tpu.vector_store %arg5[%c0_32, %c0_33, %c0_34], %112 {strides = array<i32>} : memref<1x4x8xf32, #tpu.memory_space<vmem>>, vector<1x4x8xf32>,
    } else {
    }
    %c0 = arith.constant 0 : index
    %c0_1 = arith.constant 0 : index
    %c0_2 = arith.constant 0 : index
    %3 = vector.load %arg2[%c0, %c0_1, %c0_2] : memref<1x4x512xf32, #tpu.memory_space<vmem>>, vector<1x4x512xf32>
    %4 = vector.shape_cast %3 : vector<1x4x512xf32> to vector<4x512xf32>
    %c0_3 = arith.constant 0 : index
    %c0_4 = arith.constant 0 : index
    %c0_5 = arith.constant 0 : index
    %5 = vector.load %arg3[%c0_3, %c0_4, %c0_5] : memref<1x4x512xf32, #tpu.memory_space<vmem>>, vector<1x4x512xf32>
    %6 = vector.shape_cast %5 : vector<1x4x512xf32> to vector<4x512xf32>
    %c0_6 = arith.constant 0 : index
    %c0_7 = arith.constant 0 : index
    %c0_8 = arith.constant 0 : index
    %7 = vector.load %arg4[%c0_6, %c0_7, %c0_8] : memref<1x1x512xi32, #tpu.memory_space<vmem>>, vector<1x1x512xi32>
    %8 = vector.shape_cast %7 : vector<1x1x512xi32> to vector<1x512xi32>
    %9 = tpu.iota {dimensions = array<i32: 1>} : vector<1x512xi32>
    %c512_i32 = arith.constant 512 : i32
    %10 = arith.muli %arg1, %c512_i32 : i32
    %11 = vector.broadcast %10 : i32 to vector<1x512xi32>
    %12 = arith.addi %11, %9 : vector<1x512xi32>
    %c1792_i32 = arith.constant 1792 : i32
    %13 = vector.broadcast %c1792_i32 : i32 to vector<1x512xi32>
    %14 = arith.cmpi slt, %12, %13 : vector<1x512xi32>
    %15 = arith.extui %14 : vector<1x512xi1> to vector<1x512xi32>
    %16 = arith.sitofp %15 : vector<1x512xi32> to vector<1x512xf32>
    %cst = arith.constant dense<0xFF800000> : vector<512xf32>
    %17 = vector.multi_reduction <maximumf>, %4, %cst [0] : vector<4x512xf32> to vector<512xf32>
    %18 = vector.shape_cast %17 : vector<512xf32> to vector<1x512xf32>
    %19 = vector.broadcast %18 : vector<1x512xf32> to vector<4x512xf32>
    %20 = arith.subf %4, %19 : vector<4x512xf32>
    %21 = math.exp %20 : vector<4x512xf32>
    %cst_9 = arith.constant dense<0.000000e+00> : vector<512xf32>
    %22 = vector.multi_reduction <add>, %21, %cst_9 [0] : vector<4x512xf32> to vector<512xf32>
    %23 = vector.shape_cast %22 : vector<512xf32> to vector<1x512xf32>
    %24 = tpu.reciprocal %23 : vector<1x512xf32> -> vector<1x512xf32>
    %25 = vector.broadcast %24 : vector<1x512xf32> to vector<4x512xf32>
    %26 = arith.mulf %21, %25 : vector<4x512xf32>
    %27 = tpu.iota {dimensions = array<i32: 0>} : vector<4x512xi32>
    %28 = vector.broadcast %8 : vector<1x512xi32> to vector<4x512xi32>
    %29 = arith.cmpi eq, %27, %28 : vector<4x512xi32>
    %30 = arith.extui %29 : vector<4x512xi1> to vector<4x512xi32>
    %31 = arith.sitofp %30 : vector<4x512xi32> to vector<4x512xf32>
    %32 = vector.broadcast %16 : vector<1x512xf32> to vector<4x512xf32>
    %33 = arith.mulf %31, %32 : vector<4x512xf32>
    %34 = vector.broadcast %16 : vector<1x512xf32> to vector<4x512xf32>
    %35 = arith.mulf %26, %34 : vector<4x512xf32>
    %36 = arith.mulf %26, %33 : vector<4x512xf32>
    %cst_10 = arith.constant dense<0.000000e+00> : vector<4xf32>
    %37 = vector.multi_reduction <add>, %36, %cst_10 [1] : vector<4x512xf32> to vector<4xf32>
    %38 = vector.shape_cast %37 : vector<4xf32> to vector<4x1xf32>
    %cst_11 = arith.constant dense<0.000000e+00> : vector<4xf32>
    %39 = vector.multi_reduction <add>, %35, %cst_11 [1] : vector<4x512xf32> to vector<4xf32>
    %40 = vector.shape_cast %39 : vector<4xf32> to vector<4x1xf32>
    %cst_12 = arith.constant dense<0.000000e+00> : vector<4xf32>
    %41 = vector.multi_reduction <add>, %33, %cst_12 [1] : vector<4x512xf32> to vector<4xf32>
    %42 = vector.shape_cast %41 : vector<4xf32> to vector<4x1xf32>
    %43 = arith.mulf %20, %33 : vector<4x512xf32>
    %cst_13 = arith.constant dense<0.000000e+00> : vector<512xf32>
    %44 = vector.multi_reduction <add>, %43, %cst_13 [0] : vector<4x512xf32> to vector<512xf32>
    %45 = vector.shape_cast %44 : vector<512xf32> to vector<1x512xf32>
    %46 = math.log %23 : vector<1x512xf32>
    %47 = arith.subf %46, %45 : vector<1x512xf32>
    %48 = arith.mulf %47, %16 : vector<1x512xf32>
    %cst_14 = arith.constant dense<0.000000e+00> : vector<1xf32>
    %49 = vector.multi_reduction <add>, %48, %cst_14 [1] : vector<1x512xf32> to vector<1xf32>
    %50 = vector.shape_cast %49 : vector<1xf32> to vector<1x1xf32>
    %c1_i32 = arith.constant 1 : i32
    %51 = vector.broadcast %c1_i32 : i32 to vector<1x512xi32>
    %52 = arith.cmpi eq, %8, %51 : vector<1x512xi32>
    %53 = arith.extui %52 : vector<1x512xi1> to vector<1x512xi32>
    %54 = arith.sitofp %53 : vector<1x512xi32> to vector<1x512xf32>
    %55 = arith.mulf %54, %16 : vector<1x512xf32>
    %56 = vector.broadcast %55 : vector<1x512xf32> to vector<4x512xf32>
    %57 = arith.mulf %6, %56 : vector<4x512xf32>
    %cst_15 = arith.constant dense<0.000000e+00> : vector<4xf32>
    %58 = vector.multi_reduction <add>, %57, %cst_15 [1] : vector<4x512xf32> to vector<4xf32>
    %59 = vector.shape_cast %58 : vector<4xf32> to vector<4x1xf32>
    %cst_16 = arith.constant dense<0.000000e+00> : vector<1xf32>
    %60 = vector.multi_reduction <add>, %55, %cst_16 [1] : vector<1x512xf32> to vector<1xf32>
    %61 = vector.shape_cast %60 : vector<1xf32> to vector<1x1xf32>
    %62 = tpu.iota {dimensions = array<i32: 1>} : vector<4x8xi32>
    %63 = vector.shape_cast %50 : vector<1x1xf32> to vector<1x1xf32>
    %64 = vector.broadcast %63 : vector<1x1xf32> to vector<4x1xf32>
    %65 = vector.shape_cast %61 : vector<1x1xf32> to vector<1x1xf32>
    %66 = vector.broadcast %65 : vector<1x1xf32> to vector<4x1xf32>
    %c0_i32_17 = arith.constant 0 : i32
    %67 = vector.broadcast %c0_i32_17 : i32 to vector<4x8xi32>
    %68 = arith.cmpi eq, %62, %67 : vector<4x8xi32>
    %cst_18 = arith.constant 0.000000e+00 : f32
    %69 = vector.shape_cast %38 : vector<4x1xf32> to vector<4x1xf32>
    %70 = vector.broadcast %69 : vector<4x1xf32> to vector<4x8xf32>
    %71 = vector.broadcast %cst_18 : f32 to vector<4x8xf32>
    %72 = arith.select %68, %70, %71 : vector<4x8xi1>, vector<4x8xf32>
    %c1_i32_19 = arith.constant 1 : i32
    %73 = vector.broadcast %c1_i32_19 : i32 to vector<4x8xi32>
    %74 = arith.cmpi eq, %62, %73 : vector<4x8xi32>
    %cst_20 = arith.constant 0.000000e+00 : f32
    %75 = vector.shape_cast %40 : vector<4x1xf32> to vector<4x1xf32>
    %76 = vector.broadcast %75 : vector<4x1xf32> to vector<4x8xf32>
    %77 = vector.broadcast %cst_20 : f32 to vector<4x8xf32>
    %78 = arith.select %74, %76, %77 : vector<4x8xi1>, vector<4x8xf32>
    %79 = arith.addf %72, %78 : vector<4x8xf32>
    %c2_i32 = arith.constant 2 : i32
    %80 = vector.broadcast %c2_i32 : i32 to vector<4x8xi32>
    %81 = arith.cmpi eq, %62, %80 : vector<4x8xi32>
    %cst_21 = arith.constant 0.000000e+00 : f32
    %82 = vector.shape_cast %42 : vector<4x1xf32> to vector<4x1xf32>
    %83 = vector.broadcast %82 : vector<4x1xf32> to vector<4x8xf32>
    %84 = vector.broadcast %cst_21 : f32 to vector<4x8xf32>
    %85 = arith.select %81, %83, %84 : vector<4x8xi1>, vector<4x8xf32>
    %86 = arith.addf %79, %85 : vector<4x8xf32>
    %c3_i32 = arith.constant 3 : i32
    %87 = vector.broadcast %c3_i32 : i32 to vector<4x8xi32>
    %88 = arith.cmpi eq, %62, %87 : vector<4x8xi32>
    %cst_22 = arith.constant 0.000000e+00 : f32
    %89 = vector.shape_cast %59 : vector<4x1xf32> to vector<4x1xf32>
    %90 = vector.broadcast %89 : vector<4x1xf32> to vector<4x8xf32>
    %91 = vector.broadcast %cst_22 : f32 to vector<4x8xf32>
    %92 = arith.select %88, %90, %91 : vector<4x8xi1>, vector<4x8xf32>
    %93 = arith.addf %86, %92 : vector<4x8xf32>
    %c4_i32 = arith.constant 4 : i32
    %94 = vector.broadcast %c4_i32 : i32 to vector<4x8xi32>
    %95 = arith.cmpi eq, %62, %94 : vector<4x8xi32>
    %cst_23 = arith.constant 0.000000e+00 : f32
    %96 = vector.shape_cast %64 : vector<4x1xf32> to vector<4x1xf32>
    %97 = vector.broadcast %96 : vector<4x1xf32> to vector<4x8xf32>
    %98 = vector.broadcast %cst_23 : f32 to vector<4x8xf32>
    %99 = arith.select %95, %97, %98 : vector<4x8xi1>, vector<4x8xf32>
    %100 = arith.addf %93, %99 : vector<4x8xf32>
    %c5_i32 = arith.constant 5 : i32
    %101 = vector.broadcast %c5_i32 : i32 to vector<4x8xi32>
    %102 = arith.cmpi eq, %62, %101 : vector<4x8xi32>
    %cst_24 = arith.constant 0.000000e+00 : f32
    %103 = vector.shape_cast %66 : vector<4x1xf32> to vector<4x1xf32>
    %104 = vector.broadcast %103 : vector<4x1xf32> to vector<4x8xf32>
    %105 = vector.broadcast %cst_24 : f32 to vector<4x8xf32>
    %106 = arith.select %102, %104, %105 : vector<4x8xi1>, vector<4x8xf32>
    %107 = arith.addf %100, %106 : vector<4x8xf32>
    %c0_25 = arith.constant 0 : index
    %c0_26 = arith.constant 0 : index
    %c0_27 = arith.constant 0 : index
    %108 = vector.load %arg5[%c0_25, %c0_26, %c0_27] : memref<1x4x8xf32, #tpu.memory_space<vmem>>, vector<1x4x8xf32>
    %109 = vector.shape_cast %107 : vector<4x8xf32> to vector<1x4x8xf32>
    %110 = arith.addf %108, %109 : vector<1x4x8xf32>
    %c0_28 = arith.constant 0 : index
    %c0_29 = arith.constant 0 : index
    %c0_30 = arith.constant 0 : index
    %111 = vector.load %arg5[%c0_28, %c0_29, %c0_30] : memref<1x4x8xf32, #tpu.memory_space<vmem>>, vector<1x4x8xf32>
    tpu.vector_store %arg5[%c0_28, %c0_29, %c0_30], %110 {strides = array<i32>} : memref<1x4x8xf32, #tpu.memory_space<vmem>>, vector<1x4x8xf32>,
    return
  }
  func.func @transform_0(%arg0: i32, %arg1: i32) -> (i32, i32, i32) {
    %c0_i32 = arith.constant 0 : i32
    %c0_i32_0 = arith.constant 0 : i32
    return %arg0, %c0_i32, %arg1 : i32, i32, i32
  }
  func.func @transform_1(%arg0: i32, %arg1: i32) -> (i32, i32, i32) {
    %c0_i32 = arith.constant 0 : i32
    %c0_i32_0 = arith.constant 0 : i32
    return %arg0, %c0_i32, %arg1 : i32, i32, i32
  }
  func.func @transform_2(%arg0: i32, %arg1: i32) -> (i32, i32, i32) {
    %c0_i32 = arith.constant 0 : i32
    %c0_i32_0 = arith.constant 0 : i32
    return %arg0, %c0_i32, %arg1 : i32, i32, i32
  }
  func.func @transform_3(%arg0: i32, %arg1: i32) -> (i32, i32, i32) {
    %c0_i32 = arith.constant 0 : i32
    %c0_i32_0 = arith.constant 0 : i32
    %c0_i32_1 = arith.constant 0 : i32
    return %arg0, %c0_i32, %c0_i32_0 : i32, i32, i32
  }
}

module attributes {stable_mosaic.version = 11 : i64} {
  func.func @_cosine_kernel(%arg0: i32, %arg1: i32, %arg2: memref<1x4x512xf32, #tpu.memory_space<vmem>>, %arg3: memref<4x1xf32, #tpu.memory_space<vmem>>, %arg4: memref<1x1x512xf32, #tpu.memory_space<vmem>>) attributes {dimension_semantics = [#tpu.dimension_semantics<parallel>, #tpu.dimension_semantics<arbitrary>], iteration_bounds = array<i64: 2, 4>, scalar_prefetch = 0 : i64, scratch_operands = 0 : i64, tpu.core_type = #tpu.core_type<tc>, window_params = [{transform_indices = @transform_0, window_bounds = array<i64: 1, 4, 512>}, {pipeline_mode = #tpu.pipeline_mode<synchronous>, transform_indices = @transform_1, window_bounds = array<i64: 4, 1>}, {transform_indices = @transform_2, window_bounds = array<i64: 1, 1, 512>}]} {
    %c0 = arith.constant 0 : index
    %c0_0 = arith.constant 0 : index
    %c0_1 = arith.constant 0 : index
    %0 = vector.load %arg2[%c0, %c0_0, %c0_1] : memref<1x4x512xf32, #tpu.memory_space<vmem>>, vector<1x4x512xf32>
    %1 = vector.shape_cast %0 : vector<1x4x512xf32> to vector<4x512xf32>
    %c0_2 = arith.constant 0 : index
    %c0_3 = arith.constant 0 : index
    %2 = vector.load %arg3[%c0_2, %c0_3] : memref<4x1xf32, #tpu.memory_space<vmem>>, vector<4x1xf32>
    %3 = vector.broadcast %2 : vector<4x1xf32> to vector<4x512xf32>
    %4 = arith.mulf %1, %3 : vector<4x512xf32>
    %cst = arith.constant dense<0.000000e+00> : vector<512xf32>
    %5 = vector.multi_reduction <add>, %4, %cst [0] : vector<4x512xf32> to vector<512xf32>
    %6 = vector.shape_cast %5 : vector<512xf32> to vector<1x512xf32>
    %7 = arith.mulf %1, %1 : vector<4x512xf32>
    %cst_4 = arith.constant dense<0.000000e+00> : vector<512xf32>
    %8 = vector.multi_reduction <add>, %7, %cst_4 [0] : vector<4x512xf32> to vector<512xf32>
    %9 = vector.shape_cast %8 : vector<512xf32> to vector<1x512xf32>
    %cst_5 = arith.constant 1.000000e-24 : f32
    %10 = vector.broadcast %cst_5 : f32 to vector<1x512xf32>
    %11 = arith.maximumf %9, %10 : vector<1x512xf32>
    %12 = math.rsqrt %11 : vector<1x512xf32>
    %13 = arith.mulf %6, %12 : vector<1x512xf32>
    %14 = vector.shape_cast %13 : vector<1x512xf32> to vector<1x1x512xf32>
    %c0_6 = arith.constant 0 : index
    %c0_7 = arith.constant 0 : index
    %c0_8 = arith.constant 0 : index
    %15 = vector.load %arg4[%c0_6, %c0_7, %c0_8] : memref<1x1x512xf32, #tpu.memory_space<vmem>>, vector<1x1x512xf32>
    tpu.vector_store %arg4[%c0_6, %c0_7, %c0_8], %14 {strides = array<i32>} : memref<1x1x512xf32, #tpu.memory_space<vmem>>, vector<1x1x512xf32>,
    return
  }
  func.func @transform_0(%arg0: i32, %arg1: i32) -> (i32, i32, i32) {
    %c0_i32 = arith.constant 0 : i32
    %c0_i32_0 = arith.constant 0 : i32
    return %arg0, %c0_i32, %arg1 : i32, i32, i32
  }
  func.func @transform_1(%arg0: i32, %arg1: i32) -> (i32, i32) {
    %c0_i32 = arith.constant 0 : i32
    %c0_i32_0 = arith.constant 0 : i32
    %c0_i32_1 = arith.constant 0 : i32
    return %c0_i32, %c0_i32_0 : i32, i32
  }
  func.func @transform_2(%arg0: i32, %arg1: i32) -> (i32, i32, i32) {
    %c0_i32 = arith.constant 0 : i32
    %c0_i32_0 = arith.constant 0 : i32
    return %arg0, %c0_i32, %arg1 : i32, i32, i32
  }
}

</mosaic_0001>

<bundles_post_ra>
// kernel: dc_and_ce_and_self_loss.2
= control target key start
LH: loop header
LB: loop body
LE: loop exit
PB: predicated region body
PF: predicated region fallthrough
CT: control target
= control target key end

     0   :  { %s909_s12 = smov 0   ;;  %s911_s13 = smov 0   ;;  %s1157_s0 = inlined_call_operand.vmem [shape: f32[2,4,2048], index: 0, kind: input, shape index: {}]   ;;  %s1158_s1 = inlined_call_operand.vmem [shape: f32[2,4,2048], index: 1, kind: input, shape index: {}]   ;;  %s1159_s2 = inlined_call_operand.vmem [shape: s32[2,1,2048], index: 2, kind: input, shape index: {}]   ;;  %s1160_s3 = inlined_call_operand.vmem [shape: f32[2,4,8], index: 3, kind: output, shape index: {}]  }
   0x1   :  { %s913_s14 = smov 0   ;;  %s915_s15 = smov 0  }
   0x2   :  { %s917_s16 = smov 0  }
   0x3 LB: > { %s22_s17 = sadd.s32 1, %s876_s14  ;;  %s25_s18 = sadd.s32 1, %s880_s15  ;;  %s884_s16 = sphi %s917_s16, %s13_s16   ;;  %s880_s15 = sphi %s915_s15, %s1164_s15   ;;  %s876_s14 = sphi %s913_s14, %s1163_s14   ;;  %s872_s13 = sphi %s911_s13, %s1162_s13   ;;  %s868_s12 = sphi %s909_s12, %s1161_s12  }
   0x4   : > { %p23_p0 = scmp.ge.s32.totalorder %s22_s17, 4  ;;  %p758_p1 = scmp.ge.s32.totalorder %s884_s16, 1 }
   0x5   : > { %p189_p2 = scmp.lt.s32.totalorder %s884_s16, 9 }
   0x6   : > { %s1166_s17 = smov (%p23_p0, %s22_s17), 0  ;;  %s1168_s18 = smov (!%p23_p0, %s25_s18), %s880_s15 }
   0x7   : > { %p190_p3 = pnand %p758_p1, %p189_p2  ;;  %p27_p4 = scmp.ge.s32.totalorder %s1168_s18, 2 }
   0x8   : > { %s759_s19 = sshll.u32 (!%p190_p3), %s868_s12, 2  ;;  %p234_p5 = scmp.lt.s32.totalorder (!%p190_p3), %s872_s13, 1 }
   0x9   : > { %s1170_s18 = smov (%p27_p4, %s1168_s18), 0  ;;  %193 = sbr.rel (%p190_p3) target bundleno = 263 (0x107), region = 32 }
   0xa   : > { %p236_p6 = scmp.lt.s32.totalorder (!%p190_p3), %s759_s19, 15  ;;  %p768_p7 = scmp.ne.s32.totalorder (!%p190_p3), %s868_s12, 0 }
   0xe   : > { %s1172_s13 = smov (!%p234_p5, %s872_s13), 1  ;;  %s1174_s19 = smov (!%p236_p6, %s759_s19), 15 }
   0xf   : > { %s760_s20 = sshll.u32 %s1172_s13, 4  ;;  %s767_s21 = sshll.u32 %s1172_s13, 2 }
  0x10   : > { %s942_s22 = sadd.s32 %s760_s20, %s1174_s19  ;;  %s947_s25 = scalar_lea.vmem %s1160_s3, %s767_s21 }
  0x11   : > { %s761_s26 = sshll.u32 %s942_s22, 2  ;;  %s260_s29 = scalar_lea.vmem %s1159_s2, %s942_s22 }
  0x12   : > { %s241_s5 = scalar_lea.vmem %s1157_s0, %s761_s26  ;;  %s960_s8 = scalar_lea.vmem %s1158_s1, %s761_s26 }
  0x13   : > { %269 = sbr.rel (%p768_p7) target bundleno = 26 (0x1a), region = 36 }
  0x18   : > { %vm270_vm0 = vcmask 60416   ;;  %v886_v0 = vmov 0.0  }
  0x19   : > { %271 = vst.msk [vmem:[%s947_s25] sm:$0xf] %vm270_vm0, %v886_v0 }
  0x1a PF: > { %v964_v1 = vld [vmem:[%s241_s5] sm:$0xff]  ;;  %v966_v2 = vld [vmem:[%s241_s5 + $0x8] sm:$0xff]  ;;  %v277_v3 = vlaneseq  ;;  %s769_s9 = sshll.u32 %s868_s12, 9  ;;  %vm306_vm1 = vcmask 1043456   ;;  %v887_v29 = vmov 0.0   ;;  %vm616_vm11 = vcmask 1040384  }
  0x1b   : > { %v283_v4 = vstv %s769_s9  ;;  %v302_v5 = vcombine.high %v964_v1, %v964_v1  ;;  %v303_v6 = vcombine.high %v966_v2, %v966_v2  ;;  %v307_v8 = vsel %vm306_vm1, %v964_v1, -inf  ;;  %v995_v32 = vld [vmem:[%s260_s29] sm:$0xf] }
  0x1c   : > { %v973_v7 = vand.u32 127, %v277_v3  ;;  %v321_v9 = vsel %vm306_vm1, %v966_v2, -inf  ;;  %v979_v10 = vshrl.u32 %v277_v3, 7  ;;  %v308_v11 = vrot.slane %v307_v8, 4 }
  0x1d   : > { %v314_v12 = vsel %vm306_vm1, %v302_v5, -inf  ;;  %v322_v13 = vrot.slane %v321_v9, 4  ;;  %v328_v14 = vsel %vm306_vm1, %v303_v6, -inf  ;;  %vm547_vm10 = vcmp.eq.s32.totalorder %v995_v32, 1 }
  0x1e   : > { %v279_v15 = vadd.s32 128, %v973_v7  ;;  %v280_v16 = vadd.s32 256, %v973_v7  ;;  %v281_v17 = vadd.s32 384, %v973_v7  ;;  %v284_v18 = vadd.s32 %v283_v4, %v973_v7 }
  0x1f   : > { %v309_v19 = vmax.f32 %v307_v8, %v308_v11  ;;  %v315_v20 = vrot.slane %v314_v12, 4  ;;  %v323_v21 = vmax.f32 %v321_v9, %v322_v13  ;;  %v329_v22 = vrot.slane %v328_v14, 4 }
  0x20   : > { %v285_v23 = vadd.s32 %v283_v4, %v279_v15  ;;  %v286_v24 = vadd.s32 %v283_v4, %v280_v16  ;;  %v287_v25 = vadd.s32 %v283_v4, %v281_v17  ;;  %vm288_vm2 = vcmp.lt.s32.totalorder %v284_v18, 1792 }
  0x21   : > { %v310_v26 = vrot.slane %v309_v19, 2  ;;  %v316_v27 = vmax.f32 %v314_v12, %v315_v20  ;;  %v324_v28 = vrot.slane %v323_v21, 2  ;;  %v988_v30 = vsel %vm288_vm2, 1.0, %v887_v29 }
  0x22   : > { %vm289_vm3 = vcmp.lt.s32.totalorder %v285_v23, 1792  ;;  %v330_v31 = vmax.f32 %v328_v14, %v329_v22  ;;  %vm290_vm4 = vcmp.lt.s32.totalorder %v286_v24, 1792  ;;  %vm291_vm5 = vcmp.lt.s32.totalorder %v287_v25, 1792 }
  0x23   : > { %v998_v33 = vsel %vm289_vm3, 1.0, %v887_v29  ;;  %v311_v34 = vmax.f32 %v309_v19, %v310_v26  ;;  %v317_v35 = vrot.slane %v316_v27, 2  ;;  %v325_v36 = vmax.f32 %v323_v21, %v324_v28 }
  0x24   : > { %v331_v37 = vrot.slane %v330_v31, 2  ;;  %v1001_v38 = vsub.s32 0, %v979_v10  ;;  %v405_v40 = vsub.s32 1, %v979_v10  ;;  %v409_v41 = vsub.s32 2, %v979_v10 }
  0x25   : > { %v312_v39 = vrot.slane %v311_v34, 1  ;;  %v413_v42 = vsub.s32 3, %v979_v10  ;;  %v318_v43 = vmax.f32 %v316_v27, %v317_v35  ;;  %v326_v44 = vrot.slane %v325_v36, 1 }
  0x26   : > { %v332_v45 = vmax.f32 %v330_v31, %v331_v37  ;;  %v402_v46 = vrot.slane %v995_v32, %v1001_v38  ;;  %v406_v48 = vrot.slane %v995_v32, %v405_v40  ;;  %v410_v49 = vrot.slane %v995_v32, %v409_v41 }
  0x27   : > { %v313_v47 = vmax.f32 %v311_v34, %v312_v39  ;;  %v414_v50 = vrot.slane %v995_v32, %v413_v42  ;;  %v319_v51 = vrot.slane %v318_v43, 1  ;;  %v327_v52 = vmax.f32 %v325_v36, %v326_v44 }
  0x28   : > { %v333_v53 = vrot.slane %v332_v45, 1  ;;  %vm415_vm6 = vcmp.eq.s32.totalorder %v979_v10, %v402_v46  ;;  %vm416_vm7 = vcmp.eq.s32.totalorder %v979_v10, %v406_v48  ;;  %vm417_vm8 = vcmp.eq.s32.totalorder %v979_v10, %v410_v49 }
  0x29   : > { %vm418_vm9 = vcmp.eq.s32.totalorder %v979_v10, %v414_v50  ;;  %v774_v54 = vsel %vm415_vm6, 1.0, %v887_v29  ;;  %v320_v55 = vmax.f32 %v318_v43, %v319_v51  ;;  %v775_v57 = vsel %vm416_vm7, 1.0, %v887_v29 }
  0x2a   : > { %v334_v56 = vmax.f32 %v332_v45, %v333_v53  ;;  %v776_v58 = vsel %vm417_vm8, 1.0, %v887_v29  ;;  %v1026_v59 = vsel %vm290_vm4, 1.0, %v887_v29  ;;  %v777_v60 = vsel %vm418_vm9, 1.0, %v887_v29 }
  0x2b   : > { %v427_v61 = vmul.f32 %v774_v54, %v988_v30  ;;  %v428_v62 = vmul.f32 %v775_v57, %v998_v33  ;;  %v1033_v63 = vsel %vm291_vm5, 1.0, %v887_v29  ;;  %v339_v0 = vcombine.low %v313_v47, %v320_v55 }
  0x2c   : > { %v340_v3 = vcombine.low %v327_v52, %v334_v56  ;;  %v429_v4 = vmul.f32 %v776_v58, %v1026_v59  ;;  %v430_v5 = vmul.f32 %v777_v60, %v1033_v63  ;;  %v888_v18 = vmov 1966171168   ;;  %v274_v56 = vld [vmem:[%s960_s8] sm:$0xff] }
  0x2d   : > { %v481_v6 = vsel %vm306_vm1, %v427_v61, 0.0  ;;  %v482_v8 = vsel %vm306_vm1, %v428_v62, 0.0  ;;  %v343_v9 = vsub.f32 %v964_v1, %v339_v0  ;;  %v551_v19 = vunpack.c.l.s4 %v888_v18 }
  0x2e   : > { %v344_v11 = vsub.f32 %v966_v2, %v340_v3  ;;  %v483_v12 = vadd.f32 %v482_v8, %v481_v6  ;;  %v484_v13 = vsel %vm306_vm1, %v429_v4, 0.0  ;;  %v486_v16 = vsel %vm306_vm1, %v430_v5, 0.0 }
  0x2f   : > { %v345_v14 = vmul.f32 1.442695, %v343_v9  ;;  %v1043_v20 = vcombine.low %v427_v61, %v428_v62  ;;  %v1045_v21 = vcombine.low %v429_v4, %v430_v5  ;;  %v1049_v1 = vcombine.low %v988_v30, %v998_v33  ;;  %v275_v4 = vld [vmem:[%s960_s8 + $0x8] sm:$0xff] }
  0x30   : > { %v347_v15 = vmul.f32 1.442695, %v344_v11  ;;  %v485_v17 = vadd.f32 %v484_v13, %v483_v12  ;;  %v1053_v2 = vcombine.low %v1026_v59, %v1033_v63  ;;  %v552_v23 = vunpack.c.0.s8 %v551_v19 }
  0x31   : > { %826 = vpow2.f32 %v345_v14  ;;  %v490_v25 = vmul.f32 %v1043_v20, %v343_v9  ;;  %v491_v26 = vmul.f32 %v1045_v21, %v344_v11  ;;  %v778_v36 = vsel %vm547_vm10, 1.0, %v887_v29 }
  0x32   : > { %828 = vpow2.f32 %v347_v15  ;;  %v487_v22 = vadd.f32 %v486_v16, %v485_v17  ;;  %v555_v24 = vsub.s32 %v552_v23, %v979_v10  ;;  %vm626_vm12 = vcmp.eq.s32.totalorder %v973_v7, 0 }
  0x33   : > { %v494_v34 = vcombine.high %v490_v25, %v490_v25  ;;  %v495_v35 = vcombine.high %v491_v26, %v491_v26  ;;  %v1063_v37 = vsel %vm306_vm1, %v490_v25, 0.0  ;;  %v1066_v39 = vsel %vm306_vm1, %v491_v26, 0.0 }
  0x34   : > { %488 = vadd.xlane.f32.xlu1 %v487_v22  ;;  %v556_v27 = vrot.slane %v1049_v1, %v555_v24  ;;  %v563_v28 = vrot.slane %v1053_v2, %v555_v24  ;;  %v499_v45 = vrot.slane %v1063_v37, 4  ;;  %v513_v47 = vrot.slane %v1066_v39, 4 }
  0x35   : > { %v1072_v46 = vsel %vm306_vm1, %v494_v34, 0.0  ;;  %v1076_v29 = vsel %vm306_vm1, %v495_v35, 0.0  ;;  %vm628_vm13 = vcmp.eq.s32.totalorder %v973_v7, 1  ;;  %vm631_vm14 = vcmp.eq.s32.totalorder %v973_v7, 2 }
  0x36   : > { %v564_v31 = vcombine.low %v556_v27, %v563_v28  ;;  %vm634_vm15 = vcmp.eq.s32.totalorder %v973_v7, 3  ;;  %vm637_vm0 = vcmp.eq.s32.totalorder %v973_v7, 4  ;;  %vm649_vm2 = vcmask 60416  }
  0x38   : > { %v571_v43 = vrot.slane %v564_v31, %v555_v24 }
  0x3a   : > { %v573_v44 = vmul.f32 %v778_v36, %v571_v43  ;;  %v506_v43 = vrot.slane %v1072_v46, 4 }
  0x3c   : > { %v578_v51 = vrot.slane %v573_v44, %v1001_v38  ;;  %v582_v52 = vrot.slane %v573_v44, %v405_v40  ;;  %v586_v57 = vrot.slane %v573_v44, %v409_v41  ;;  %v590_v61 = vrot.slane %v573_v44, %v413_v42 }
  0x3e   : > { %v1068_v32 = vpop.eup %826  ;;  %v591_v62 = vcombine.low %v578_v51, %v582_v52  ;;  %v617_v5 = vsel %vm616_vm11, %v578_v51, 0.0  ;;  %v592_v9 = vcombine.low %v586_v57, %v590_v61  ;;  %v618_v13 = vsel %vm616_vm11, %v582_v52, 0.0 }
  0x3f   : > { %v1078_v48 = vpop.eup %828  ;;  %v351_v49 = vcombine.high %v1068_v32, %v1068_v32  ;;  %v355_v50 = vsel %vm306_vm1, %v1068_v32, 0.0  ;;  %v620_v14 = vsel %vm616_vm11, %v586_v57, 0.0  ;;  %v619_v22 = vadd.f32 %v618_v13, %v617_v5 }
  0x40   : > { %v352_v53 = vcombine.high %v1078_v48, %v1078_v48  ;;  %v356_v54 = vrot.slane %v355_v50, 4  ;;  %v369_v55 = vsel %vm306_vm1, %v1078_v48, 0.0  ;;  %v595_v11 = vmul.f32 %v591_v62, %v274_v56 }
  0x41   : > { %v362_v58 = vsel %vm306_vm1, %v351_v49, 0.0  ;;  %v370_v60 = vrot.slane %v369_v55, 4  ;;  %v596_v15 = vmul.f32 %v592_v9, %v275_v4  ;;  %v621_v52 = vadd.f32 %v620_v14, %v619_v22 }
  0x42   : > { %v357_v0 = vadd.f32 %v356_v54, %v355_v50  ;;  %v363_v40 = vrot.slane %v362_v58, 4  ;;  %v376_v3 = vsel %vm306_vm1, %v352_v53, 0.0  ;;  %v599_v16 = vcombine.high %v595_v11, %v595_v11 }
  0x43   : > { %v371_v6 = vadd.f32 %v370_v60, %v369_v55  ;;  %v377_v8 = vrot.slane %v376_v3, 4  ;;  %v603_v19 = vsel %vm306_vm1, %v595_v11, 0.0  ;;  %v600_v25 = vcombine.high %v596_v15, %v596_v15 }
  0x44   : > { %v358_v12 = vrot.slane %v357_v0, 2  ;;  %v364_v41 = vadd.f32 %v363_v40, %v362_v58  ;;  %v604_v26 = vsel %vm306_vm1, %v599_v16, 0.0  ;;  %v606_v34 = vsel %vm306_vm1, %v596_v15, 0.0 }
  0x45   : > { %v372_v10 = vrot.slane %v371_v6, 2  ;;  %v378_v42 = vadd.f32 %v377_v8, %v376_v3  ;;  %v605_v31 = vadd.f32 %v604_v26, %v603_v19  ;;  %v608_v44 = vsel %vm306_vm1, %v600_v25, 0.0 }
  0x46   : > { %v359_v17 = vadd.f32 %v358_v12, %v357_v0  ;;  %v365_v18 = vrot.slane %v364_v41, 2  ;;  %v622_v55 = vsel %vm616_vm11, %v590_v61, 0.0  ;;  %v520_v56 = vrot.slane %v1076_v29, 4 }
  0x47   : > { %v373_v23 = vadd.f32 %v372_v10, %v371_v6  ;;  %v379_v24 = vrot.slane %v378_v42, 2  ;;  %v607_v51 = vadd.f32 %v606_v34, %v605_v31  ;;  %v500_v58 = vadd.f32 %v499_v45, %v1063_v37 }
  0x48   : > { %v360_v27 = vrot.slane %v359_v17, 1  ;;  %v366_v28 = vadd.f32 %v365_v18, %v364_v41  ;;  %v507_v0 = vadd.f32 %v506_v43, %v1072_v46  ;;  %v623_v40 = vadd.f32 %v622_v55, %v621_v52 }
  0x49   : > { %v374_v35 = vrot.slane %v373_v23, 1  ;;  %v380_v36 = vadd.f32 %v379_v24, %v378_v42  ;;  %v609_v60 = vadd.f32 %v608_v44, %v607_v51  ;;  %v514_v3 = vadd.f32 %v513_v47, %v1066_v39 }
  0x4a   : > { %v361_v49 = vadd.f32 %v360_v27, %v359_v17  ;;  %v367_v50 = vrot.slane %v366_v28, 1  ;;  %v521_v61 = vadd.f32 %v520_v56, %v1076_v29  ;;  %v501_v4 = vrot.slane %v500_v58, 2 }
  0x4b   : > { %v375_v53 = vadd.f32 %v374_v35, %v373_v23  ;;  %v381_v54 = vrot.slane %v380_v36, 1  ;;  %610 = vadd.xlane.f32.xlu1 %v609_v60  ;;  %v508_v5 = vrot.slane %v507_v0, 2  ;;  %v515_v37 = vrot.slane %v514_v3, 2 }
  0x4c   : > { %v368_v57 = vadd.f32 %v367_v50, %v366_v28  ;;  %830 = vrcp.f32 %v361_v49  ;;  %v522_v45 = vrot.slane %v521_v61, 2  ;;  %v502_v46 = vadd.f32 %v501_v4, %v500_v58 }
  0x4d   : > { %v382_v62 = vadd.f32 %v381_v54, %v380_v36  ;;  %832 = vrcp.f32 %v375_v53  ;;  %v509_v6 = vadd.f32 %v508_v5, %v507_v0  ;;  %v516_v8 = vadd.f32 %v515_v37, %v514_v3 }
  0x4e   : > { %834 = vrcp.f32 %v368_v57  ;;  %v523_v9 = vadd.f32 %v522_v45, %v521_v61  ;;  %v503_v11 = vrot.slane %v502_v46, 1 }
  0x4f   : > { %836 = vrcp.f32 %v382_v62  ;;  %624 = vadd.xlane.f32.xlu1 %v623_v40  ;;  %v510_v41 = vrot.slane %v509_v6, 1  ;;  %v517_v47 = vrot.slane %v516_v8, 1 }
  0x50   : > { %838 = vlog2.f32 %v361_v49  ;;  %v524_v29 = vrot.slane %v523_v9, 1  ;;  %v504_v42 = vadd.f32 %v503_v11, %v502_v46 }
  0x51   : > { %840 = vlog2.f32 %v368_v57  ;;  %v511_v17 = vadd.f32 %v510_v41, %v509_v6  ;;  %v518_v25 = vadd.f32 %v517_v47, %v516_v8 }
  0x52   : > { %842 = vlog2.f32 %v375_v53  ;;  %v525_v26 = vadd.f32 %v524_v29, %v523_v9 }
  0x53   : > { %844 = vlog2.f32 %v382_v62 }
  0x59   : > { %v831_v12 = vpop.eup %830 }
  0x5a   : > { %v833_v13 = vpop.eup %832 }
  0x5b   : > { %v835_v39 = vpop.eup %834 }
  0x5c   : > { %v837_v14 = vpop.eup %836  ;;  %v391_v10 = vcombine.low %v831_v12, %v835_v39 }
  0x5d   : > { %v839_v15 = vpop.eup %838  ;;  %v392_v16 = vcombine.low %v833_v13, %v837_v14 }
  0x5e   : > { %v841_v18 = vpop.eup %840  ;;  %v395_v19 = vmul.f32 %v1068_v32, %v391_v10  ;;  %v527_v22 = vmul.f32 0.6931472, %v839_v15 }
  0x5f   : > { %v843_v23 = vpop.eup %842  ;;  %v396_v24 = vmul.f32 %v1078_v48, %v392_v16  ;;  %v529_v27 = vmul.f32 0.6931472, %v841_v18 }
  0x60   : > { %v845_v28 = vpop.eup %844  ;;  %v449_v31 = vmul.f32 %v1043_v20, %v395_v19  ;;  %v439_v34 = vmul.f32 %v1049_v1, %v395_v19  ;;  %v531_v35 = vmul.f32 0.6931472, %v843_v23  ;;  %v534_v36 = vsub.f32 %v527_v22, %v504_v42 }
  0x61   : > { %v450_v43 = vmul.f32 %v1045_v21, %v396_v24  ;;  %v440_v44 = vmul.f32 %v1053_v2, %v396_v24  ;;  %v533_v49 = vmul.f32 0.6931472, %v845_v28  ;;  %v535_v32 = vsub.f32 %v529_v27, %v511_v17  ;;  %v647_v17 = vld [vmem:[%s947_s25] sm:$0xf] }
  0x62   : > { %v453_v50 = vcombine.high %v449_v31, %v449_v31  ;;  %v457_v51 = vsel %vm306_vm1, %v449_v31, 0.0  ;;  %v468_v48 = vcombine.high %v439_v34, %v439_v34  ;;  %v472_v52 = vsel %vm306_vm1, %v439_v34, 0.0 }
  0x63   : > { %v454_v53 = vcombine.high %v450_v43, %v450_v43  ;;  %v460_v54 = vsel %vm306_vm1, %v450_v43, 0.0  ;;  %v469_v20 = vcombine.high %v440_v44, %v440_v44  ;;  %v475_v1 = vsel %vm306_vm1, %v440_v44, 0.0 }
  0x64   : > { %v458_v55 = vsel %vm306_vm1, %v453_v50, 0.0  ;;  %v473_v21 = vsel %vm306_vm1, %v468_v48, 0.0  ;;  %v536_v56 = vsub.f32 %v531_v35, %v518_v25  ;;  %v537_v2 = vsub.f32 %v533_v49, %v525_v26 }
  0x65   : > { %v459_v57 = vadd.f32 %v458_v55, %v457_v51  ;;  %v474_v58 = vadd.f32 %v473_v21, %v472_v52  ;;  %v462_v60 = vsel %vm306_vm1, %v454_v53, 0.0  ;;  %v538_v62 = vmul.f32 %v988_v30, %v534_v36 }
  0x66   : > { %v539_v0 = vmul.f32 %v998_v33, %v535_v32  ;;  %v540_v40 = vmul.f32 %v1026_v59, %v536_v56  ;;  %v477_v4 = vsel %vm306_vm1, %v469_v20, 0.0  ;;  %v541_v5 = vmul.f32 %v1033_v63, %v537_v2 }
  0x67   : > { %v461_v3 = vadd.f32 %v460_v54, %v459_v57  ;;  %v476_v61 = vadd.f32 %v475_v1, %v474_v58  ;;  %vm640_vm1 = vcmp.eq.s32.totalorder %v973_v7, 5 }
  0x68   : > { %v542_v37 = vadd.f32 %v539_v0, %v538_v62 }
  0x69   : > { %v463_v45 = vadd.f32 %v462_v60, %v461_v3  ;;  %v478_v6 = vadd.f32 %v477_v4, %v476_v61 }
  0x6a   : > { %v543_v46 = vadd.f32 %v542_v37, %v540_v40 }
  0x6b   : > { %464 = vadd.xlane.f32.xlu0 %v463_v45 }
  0x6c   : > { %v544_v8 = vadd.f32 %v543_v46, %v541_v5 }
  0x6f   : > { %479 = vadd.xlane.f32.xlu0 %v478_v6 }
  0x73   : > { %545 = vadd.xlane.f32.xlu0 %v544_v8 }
  0xbd   : > { %v489_v9 = vpop.xlane.xlu1 %488 }
  0xbe   : > { %v632_v13 = vsel %vm631_vm14, %v489_v9, 0.0 }
  0xd4   : > { %v611_v30 = vpop.xlane.xlu1 %610 }
  0xd5   : > { %v635_v14 = vsel %vm634_vm15, %v611_v30, 0.0 }
  0xd8   : > { %v625_v59 = vpop.xlane.xlu1 %624 }
  0xd9   : > { %v644_v39 = vrot.slane %v625_v59, %v1001_v38 }
  0xdb   : > { %v645_v15 = vsel %vm640_vm1, %v644_v39, 0.0 }
  0xf4   : > { %v465_v11 = vpop.xlane.xlu0 %464 }
  0xf5   : > { %v627_v63 = vsel %vm626_vm12, %v465_v11, 0.0 }
  0xf8   : > { %v480_v33 = vpop.xlane.xlu0 %479 }
  0xf9   : > { %v629_v12 = vsel %vm628_vm13, %v480_v33, 0.0 }
  0xfa   : > { %v630_v41 = vadd.f32 %v629_v12, %v627_v63 }
  0xfc   : > { %v633_v47 = vadd.f32 %v632_v13, %v630_v41  ;;  %v546_v29 = vpop.xlane.xlu0 %545 }
  0xfd   : > { %v638_v10 = vsel %vm637_vm0, %v546_v29, 0.0 }
  0xfe   : > { %v636_v42 = vadd.f32 %v635_v14, %v633_v47 }
 0x100   : > { %v639_v16 = vadd.f32 %v638_v10, %v636_v42 }
 0x102   : > { %v646_v18 = vadd.f32 %v645_v15, %v639_v16 }
 0x104   : > { %v648_v19 = vadd.f32 %v647_v17, %v646_v18 }
 0x106   : > { %650 = vst.msk [vmem:[%s947_s25] sm:$0xf] %vm649_vm2, %v648_v19 }
 0x107 PF: > { %s13_s16 = sadd.s32 1, %s884_s16   ;;  %s1161_s12 = smov %s876_s14 }
 0x108   : > { %p10_p8 = scmp.ge.s32.totalorder %s13_s16, 10   ;;  %s1162_s13 = smov %s880_s15 }
 0x109   : > { %s1163_s14 = smov %s1166_s17  ;;  %s1164_s15 = smov %s1170_s18 }
 0x10a   :  { %12 = sbr.rel (!%p10_p8) target bundleno = 3 (0x3), region = 72 }

// kernel: dc_and_ce_and_self_loss.3
= control target key start
LH: loop header
LB: loop body
LE: loop exit
PB: predicated region body
PF: predicated region fallthrough
CT: control target
= control target key end

     0   :  { %s521_s9 = smov 0   ;;  %s523_s10 = smov 0   ;;  %s589_s0 = inlined_call_operand.vmem [shape: f32[2,4,2048], index: 0, kind: input, shape index: {}]   ;;  %s590_s1 = inlined_call_operand.vmem [shape: f32[4,1], index: 1, kind: input, shape index: {}]   ;;  %s591_s2 = inlined_call_operand.vmem [shape: f32[2,1,2048], index: 2, kind: output, shape index: {}]  }
   0x1   :  { %s525_s11 = smov 0   ;;  %s527_s12 = smov 0  }
   0x2   :  { %s529_s13 = smov 0  }
   0x3 LB: > { %s21_s14 = sadd.s32 1, %s493_s11  ;;  %s24_s15 = sadd.s32 1, %s497_s12  ;;  %s501_s13 = sphi %s529_s13, %s12_s13   ;;  %s497_s12 = sphi %s527_s12, %s595_s12   ;;  %s493_s11 = sphi %s525_s11, %s594_s11   ;;  %s489_s10 = sphi %s523_s10, %s593_s10   ;;  %s485_s9 = sphi %s521_s9, %s592_s9  }
   0x4   : > { %p22_p0 = scmp.ge.s32.totalorder %s21_s14, 4  ;;  %p403_p1 = scmp.ge.s32.totalorder %s501_s13, 1 }
   0x5   : > { %p133_p2 = scmp.lt.s32.totalorder %s501_s13, 9 }
   0x6   : > { %s597_s14 = smov (%p22_p0, %s21_s14), 0  ;;  %s599_s15 = smov (!%p22_p0, %s24_s15), %s497_s12 }
   0x7   : > { %p134_p3 = pnand %p403_p1, %p133_p2  ;;  %p26_p4 = scmp.ge.s32.totalorder %s599_s15, 2 }
   0x8   : > { %s404_s18 = sshll.u32 (!%p134_p3), %s485_s9, 2  ;;  %p163_p5 = scmp.lt.s32.totalorder (!%p134_p3), %s489_s10, 1 }
   0x9   : > { %s601_s15 = smov (%p26_p4, %s599_s15), 0  ;;  %137 = sbr.rel (%p134_p3) target bundleno = 170 (0xaa), region = 28 }
   0xa   : > { %p165_p6 = scmp.lt.s32.totalorder (!%p134_p3), %s404_s18, 15 }
   0xe   : > { %v183_v0 = vld [vmem:[%s590_s1] sm:$0xf]  ;;  %v503_v1 = vmov 0   ;;  %s603_s10 = smov (!%p163_p5, %s489_s10), 1  ;;  %s605_s18 = smov (!%p165_p6, %s404_s18), 15  ;;  %vm204_vm0 = vcmask 1043456   ;;  %v191_v30 = vlaneseq }
   0xf   : > { %454 = vset.pattern.permute.xlu0 %v503_v1  ;;  %s405_s19 = sshll.u32 %s603_s10, 4  ;;  %v504_v28 = vmov 839922192  }
  0x10   : > { %186 = vperm.xlu0 %454, %v183_v0   ;;  %s554_s20 = sadd.s32 %s405_s19, %s605_s18  ;;  %v189_v29 = vunpack.c.l.s4 %v504_v28  ;;  %v192_v36 = vshrl.u32 %v191_v30, 7  ;;  %vm312_vm1 = vcmp.lt.s32.totalorder %v191_v30, 512 }
  0x11   : > { %s406_s21 = sshll.u32 %s554_s20, 2  ;;  %s179_s27 = scalar_lea.vmem %s591_s2, %s554_s20 }
  0x12   : > { %s170_s24 = scalar_lea.vmem %s589_s0, %s406_s21  ;;  %v190_v35 = vunpack.c.0.s8 %v189_v29 }
  0x13   : > { %v181_v2 = vld [vmem:[%s170_s24] sm:$0xff]  ;;  %v182_v3 = vld [vmem:[%s170_s24 + $0x8] sm:$0xff] }
  0x14   : > { %v233_v4 = vmul.f32 %v181_v2, %v181_v2  ;;  %v234_v5 = vmul.f32 %v182_v3, %v182_v3  ;;  %v193_v41 = vsub.s32 %v190_v35, %v192_v36 }
  0x16   : > { %v237_v6 = vcombine.high %v233_v4, %v233_v4  ;;  %v238_v7 = vcombine.high %v234_v5, %v234_v5  ;;  %v241_v8 = vsel %vm204_vm0, %v233_v4, 0.0  ;;  %v255_v9 = vsel %vm204_vm0, %v234_v5, 0.0 }
  0x17   : > { %v242_v11 = vrot.slane %v241_v8, 4  ;;  %v256_v13 = vrot.slane %v255_v9, 4 }
  0x18   : > { %v248_v10 = vsel %vm204_vm0, %v237_v6, 0.0  ;;  %v262_v12 = vsel %vm204_vm0, %v238_v7, 0.0 }
  0x19   : > { %v249_v14 = vrot.slane %v248_v10, 4  ;;  %v263_v15 = vrot.slane %v262_v12, 4  ;;  %v243_v16 = vadd.f32 %v242_v11, %v241_v8  ;;  %v257_v17 = vadd.f32 %v256_v13, %v255_v9 }
  0x1b   : > { %v250_v18 = vadd.f32 %v249_v14, %v248_v10  ;;  %v264_v19 = vadd.f32 %v263_v15, %v262_v12  ;;  %v244_v20 = vrot.slane %v243_v16, 2  ;;  %v258_v21 = vrot.slane %v257_v17, 2 }
  0x1d   : > { %v251_v22 = vrot.slane %v250_v18, 2  ;;  %v265_v23 = vrot.slane %v264_v19, 2  ;;  %v245_v24 = vadd.f32 %v244_v20, %v243_v16  ;;  %v259_v25 = vadd.f32 %v258_v21, %v257_v17 }
  0x1f   : > { %v252_v26 = vadd.f32 %v251_v22, %v250_v18  ;;  %v266_v27 = vadd.f32 %v265_v23, %v264_v19  ;;  %v246_v31 = vrot.slane %v245_v24, 1  ;;  %v260_v32 = vrot.slane %v259_v25, 1 }
  0x21   : > { %v253_v33 = vrot.slane %v252_v26, 1  ;;  %v267_v34 = vrot.slane %v266_v27, 1  ;;  %v247_v37 = vadd.f32 %v246_v31, %v245_v24  ;;  %v261_v38 = vadd.f32 %v260_v32, %v259_v25 }
  0x23   : > { %v254_v39 = vadd.f32 %v253_v33, %v252_v26  ;;  %v268_v40 = vadd.f32 %v267_v34, %v266_v27  ;;  %v269_v42 = vmax.f32 %v247_v37, 1e-24  ;;  %v271_v43 = vmax.f32 %v261_v38, 1e-24 }
  0x25   : > { %v270_v44 = vmax.f32 %v254_v39, 1e-24  ;;  %v272_v46 = vmax.f32 %v268_v40, 1e-24  ;;  %455 = vrsqrt.f32 %v269_v42 }
  0x26   : > { %457 = vrsqrt.f32 %v271_v43 }
  0x27   : > { %459 = vrsqrt.f32 %v270_v44 }
  0x28   : > { %461 = vrsqrt.f32 %v272_v46 }
  0x32   : > { %v456_v8 = vpop.eup %455 }
  0x33   : > { %v458_v13 = vpop.eup %457 }
  0x34   : > { %v460_v15 = vpop.eup %459 }
  0x35   : > { %v462_v20 = vpop.eup %461 }
  0x8b   : > { %v187_v45 = vpop.permute.xlu0 %186 }
  0x8c   : > { %v194_v47 = vrot.slane %v187_v45, %v193_v41 }
  0x8e   : > { %v196_v48 = vmul.f32 %v194_v47, %v181_v2  ;;  %v197_v49 = vmul.f32 %v194_v47, %v182_v3  ;;  %v505_v2 = vmov 1966171168  }
  0x8f   : > { %v288_v3 = vunpack.c.l.s4 %v505_v2 }
  0x90   : > { %v200_v50 = vcombine.high %v196_v48, %v196_v48  ;;  %v201_v51 = vcombine.high %v197_v49, %v197_v49  ;;  %v205_v52 = vsel %vm204_vm0, %v196_v48, 0.0  ;;  %v219_v53 = vsel %vm204_vm0, %v197_v49, 0.0 }
  0x91   : > { %v206_v54 = vrot.slane %v205_v52, 4  ;;  %v220_v55 = vrot.slane %v219_v53, 4  ;;  %v289_v14 = vunpack.c.0.s8 %v288_v3 }
  0x92   : > { %v212_v56 = vsel %vm204_vm0, %v200_v50, 0.0  ;;  %v226_v57 = vsel %vm204_vm0, %v201_v51, 0.0 }
  0x93   : > { %v207_v58 = vadd.f32 %v206_v54, %v205_v52  ;;  %v213_v59 = vrot.slane %v212_v56, 4  ;;  %v221_v60 = vadd.f32 %v220_v55, %v219_v53  ;;  %v227_v61 = vrot.slane %v226_v57, 4 }
  0x94   : > { %v292_v23 = vsub.s32 %v289_v14, %v192_v36 }
  0x95   : > { %v208_v62 = vrot.slane %v207_v58, 2  ;;  %v214_v63 = vadd.f32 %v213_v59, %v212_v56  ;;  %v222_v0 = vrot.slane %v221_v60, 2  ;;  %v228_v1 = vadd.f32 %v227_v61, %v226_v57 }
  0x97   : > { %v209_v4 = vadd.f32 %v208_v62, %v207_v58  ;;  %v215_v5 = vrot.slane %v214_v63, 2  ;;  %v223_v6 = vadd.f32 %v222_v0, %v221_v60  ;;  %v229_v7 = vrot.slane %v228_v1, 2 }
  0x99   : > { %v210_v9 = vrot.slane %v209_v4, 1  ;;  %v216_v10 = vadd.f32 %v215_v5, %v214_v63  ;;  %v224_v11 = vrot.slane %v223_v6, 1  ;;  %v230_v12 = vadd.f32 %v229_v7, %v228_v1 }
  0x9b   : > { %v211_v16 = vadd.f32 %v210_v9, %v209_v4  ;;  %v217_v17 = vrot.slane %v216_v10, 1  ;;  %v225_v18 = vadd.f32 %v224_v11, %v223_v6  ;;  %v231_v19 = vrot.slane %v230_v12, 1 }
  0x9d   : > { %v218_v21 = vadd.f32 %v217_v17, %v216_v10  ;;  %v232_v22 = vadd.f32 %v231_v19, %v230_v12  ;;  %v277_v24 = vmul.f32 %v456_v8, %v211_v16  ;;  %v279_v26 = vmul.f32 %v458_v13, %v225_v18 }
  0x9f   : > { %v278_v25 = vmul.f32 %v460_v15, %v218_v21  ;;  %v280_v27 = vmul.f32 %v462_v20, %v232_v22 }
  0xa1   : > { %v285_v28 = vcombine.low %v277_v24, %v278_v25  ;;  %v286_v29 = vcombine.low %v279_v26, %v280_v27 }
  0xa3   : > { %v293_v31 = vrot.slane %v285_v28, %v292_v23  ;;  %v300_v32 = vrot.slane %v286_v29, %v292_v23 }
  0xa5   : > { %v301_v33 = vcombine.low %v293_v31, %v300_v32 }
  0xa7   : > { %v308_v34 = vrot.slane %v301_v33, %v292_v23 }
  0xa9   : > { %314 = vst.msk [vmem:[%s179_s27] sm:$0xf] %vm312_vm1, %v308_v34 }
  0xaa PF: > { %s12_s13 = sadd.s32 1, %s501_s13   ;;  %s592_s9 = smov %s493_s11 }
  0xab   : > { %p9_p7 = scmp.ge.s32.totalorder %s12_s13, 10   ;;  %s593_s10 = smov %s497_s12 }
  0xac   : > { %s594_s11 = smov %s597_s14  ;;  %s595_s12 = smov %s601_s15 }
  0xad   :  { %11 = sbr.rel (!%p9_p7) target bundleno = 3 (0x3), region = 58 }

</bundles_post_ra>
